<compile_context>
chip_gen: v6e
topology: v6e:2x2x1
jax: 0.10.0
libtpu: 0.0.40
codegen_flags: <defaults>
</compile_context>

<pallas_src>
import math

import jax
import jax.numpy as jnp
from jax import lax
from jax.experimental import pallas as pl
from jax.experimental.pallas import tpu as pltpu

HIDDEN = 32
NUM_HEADS = 4
HEAD_DIM = HIDDEN // NUM_HEADS          # 8
HALF_DIM = HEAD_DIM // 2                # 4
INTERMEDIATE = 64
RMS_EPS = 1e-6

Q_OFF = 0
K_OFF = HIDDEN
V_OFF = 2 * HIDDEN


def encoder_layer_kernel(x_ref, cos_ref, sin1_ref, sin2_ref,
                         seg_row_ref, seg_col_ref,
                         wqkv_ref, bqkv_ref, wo_ref, wgu_ref, wd_ref,
                         ln1_ref, ln2_ref, out_ref):
    """Fully fused encoder layer; all operands fit in VMEM at these shapes."""
    f32 = jnp.float32
    bf16 = jnp.bfloat16

    x = x_ref[...].astype(f32)                                  # (N, H)

    # ---- input RMSNorm (f32) ----
    var = jnp.mean(x * x, axis=-1, keepdims=True)
    h = x * lax.rsqrt(var + RMS_EPS) * ln1_ref[...]

    # ---- fused q/k/v projection: one bf16 MXU pass, f32 accumulation.
    #      1/sqrt(head_dim) is pre-folded into the q slice of wqkv / bqkv. ----
    qkv = jnp.dot(h.astype(bf16), wqkv_ref[...],
                  preferred_element_type=f32) + bqkv_ref[...]   # (N, 3H) f32

    q = qkv[:, Q_OFF:Q_OFF + HIDDEN]                            # (N, H) f32
    k = qkv[:, K_OFF:K_OFF + HIDDEN]
    v = qkv[:, V_OFF:V_OFF + HIDDEN]

    # ---- slab-wide RoPE: q_rot = q*cos + rotate_half(q)*sin for all heads at once.
    #      cos_ref is the head-tiled cos table; sin1_ref = -sin on first-half lanes
    #      (0 elsewhere), sin2_ref = +sin on second-half lanes (0 elsewhere), so the
    #      wrap-around lanes of the lane shifts are multiplied by zero. ----
    cos_t = cos_ref[...]
    sin1_t = sin1_ref[...]
    sin2_t = sin2_ref[...]

    def rope(t):
        t_left = jnp.concatenate([t[:, HALF_DIM:], t[:, :HALF_DIM]], axis=1)    # t[l+4]
        t_right = jnp.concatenate([t[:, -HALF_DIM:], t[:, :-HALF_DIM]], axis=1)  # t[l-4]
        return t * cos_t + t_left * sin1_t + t_right * sin2_t

    qr = rope(q)                                                # (N, H) f32, pre-scaled
    kr = rope(k)

    # ---- block-diagonal varlen mask from O(N) segment ids (no (N,N) bias tensor) --
    seg_eq = seg_row_ref[...] == seg_col_ref[...]               # (N, N) bool
    neg_inf = jnp.float32(-1e30)

    dim_nums = (((1,), (1,)), ((), ()))       # contract last dims, no batch dims
    o_heads = []
    for hh in range(NUM_HEADS):
        sl = slice(hh * HEAD_DIM, (hh + 1) * HEAD_DIM)

        # scores (single f32 matmul per head; softmax path stays f32)
        s_ = lax.dot_general(qr[:, sl], kr[:, sl], dim_nums,
                             preferred_element_type=f32)        # (N, N)
        s_ = jnp.where(seg_eq, s_, neg_inf)
        s_ = s_ - jnp.max(s_, axis=-1, keepdims=True)
        p = jnp.exp(s_)
        denom = jnp.sum(p, axis=-1, keepdims=True)

        # unnormalized p @ V in bf16, normalize afterwards with EUP reciprocal
        oh = jnp.dot(p.astype(bf16), v[:, sl].astype(bf16),
                     preferred_element_type=f32)                # (N, Dh)
        o_heads.append(oh * pl.reciprocal(denom, approx=True))

    # assemble heads in-register (no VMEM scratch round-trip), then o_proj
    attn = jnp.concatenate(o_heads, axis=1)                     # (N, H) f32
    attn_out = jnp.dot(attn.astype(bf16), wo_ref[...],
                       preferred_element_type=f32)
    x1 = x + attn_out                                           # residual 1

    # ---- post-attention RMSNorm (f32) ----
    var2 = jnp.mean(x1 * x1, axis=-1, keepdims=True)
    h2 = x1 * lax.rsqrt(var2 + RMS_EPS) * ln2_ref[...]

    # ---- LlamaMLP: down( silu(gate(x)) * up(x) ), gate/up fused into one dot ----
    gu = jnp.dot(h2.astype(bf16), wgu_ref[...],
                 preferred_element_type=f32)                    # (N, 2I)
    g = gu[:, :INTERMEDIATE]
    u = gu[:, INTERMEDIATE:]
    act = g * (1.0 / (1.0 + jnp.exp(-g)))                       # SiLU (f32, EUP exp)
    mlp = jnp.dot((act * u).astype(bf16), wd_ref[...],
                  preferred_element_type=f32)

    out_ref[...] = (x1 + mlp).astype(out_ref.dtype)             # residual 2


def prepare_encoder_params(params):
    """One-time weight prep (hoisted out of the per-call path):
    fuse q/k/v and gate/up, cast to bf16, fold the softmax scale into the q slice."""
    bf16 = jnp.bfloat16
    scale = 1.0 / math.sqrt(HEAD_DIM)
    wqkv = jnp.concatenate(
        [params["wq"] * scale, params["wk"], params["wv"]], axis=1).astype(bf16)   # (H, 3H)
    bqkv = jnp.concatenate(
        [params["bq"] * scale, params["bk"], params["bv"]], axis=1).astype(jnp.float32)  # (1, 3H)
    wgu = jnp.concatenate([params["wg"], params["wu"]], axis=1).astype(bf16)        # (H, 2I)
    return dict(
        wqkv=wqkv, bqkv=bqkv, wgu=wgu,
        wo=params["wo"].astype(bf16), wd=params["wd"].astype(bf16),
        ln1=params["ln1"].astype(jnp.float32), ln2=params["ln2"].astype(jnp.float32))


def encoder_layer(x, pos_cos, pos_sin, seg_ids, prepped):
    """Per-call wrapper: build O(N*H) RoPE tables / O(N) segment vectors, call kernel."""
    n = x.shape[0]

    # head-tiled RoPE tables; rotate-half sign/selection folded into two sin tables
    cos_t = jnp.tile(pos_cos, (1, NUM_HEADS)).astype(jnp.float32)      # (N, H)
    sin_t = jnp.tile(pos_sin, (1, NUM_HEADS)).astype(jnp.float32)
    first_half = ((jnp.arange(HIDDEN) % HEAD_DIM) < HALF_DIM)[None, :]
    sin1_t = jnp.where(first_half, -sin_t, 0.0)                        # first-half lanes
    sin2_t = jnp.where(first_half, 0.0, sin_t)                         # second-half lanes

    seg_ids = seg_ids.astype(jnp.int32)
    seg_row = seg_ids.reshape(n, 1)
    seg_col = seg_ids.reshape(1, n)

    args = (x, cos_t, sin1_t, sin2_t, seg_row, seg_col,
            prepped["wqkv"], prepped["bqkv"], prepped["wo"],
            prepped["wgu"], prepped["wd"], prepped["ln1"], prepped["ln2"])
    vmem = pl.BlockSpec(memory_space=pltpu.MemorySpace.VMEM)
    return pl.pallas_call(
        encoder_layer_kernel,
        out_shape=jax.ShapeDtypeStruct(x.shape, x.dtype),
        in_specs=[vmem] * len(args),
        out_specs=vmem,
    )(*args)


encoder_layer_jit = jax.jit(encoder_layer)


# ---------------- pure-JAX reference (mirrors the kernel's bf16 matmuls) --------
def _rotate_half(t):
    d = t.shape[-1]
    return jnp.concatenate([-t[..., d // 2:], t[..., :d // 2]], axis=-1)


def _reference(x, cos, sin, seg_ids, p):
    bf16 = jnp.bfloat16

    def mm(a, w):
        return jnp.dot(a.astype(bf16), w.astype(bf16),
                       preferred_element_type=jnp.float32)

    n = x.shape[0]
    var = jnp.mean(x * x, -1, keepdims=True)
    h = x * lax.rsqrt(var + RMS_EPS) * p["ln1"]
    q = (mm(h, p["wq"]) + p["bq"]).reshape(n, NUM_HEADS, HEAD_DIM)
    k = (mm(h, p["wk"]) + p["bk"]).reshape(n, NUM_HEADS, HEAD_DIM)
    v = (mm(h, p["wv"]) + p["bv"]).reshape(n, NUM_HEADS, HEAD_DIM)
    c, s = cos[:, None, :], sin[:, None, :]
    q = q * c + _rotate_half(q) * s
    k = k * c + _rotate_half(k) * s
    bias = jnp.where(seg_ids[:, None] == seg_ids[None, :], 0.0, -1e30)
    sc = jnp.einsum("qhd,khd->hqk", q, k) / math.sqrt(HEAD_DIM) + bias[None]
    pr = jax.nn.softmax(sc, axis=-1)
    o = jnp.einsum("hqk,khd->qhd", pr, v).reshape(n, HIDDEN)
    x1 = x + mm(o, p["wo"])
    var2 = jnp.mean(x1 * x1, -1, keepdims=True)
    h2 = x1 * lax.rsqrt(var2 + RMS_EPS) * p["ln2"]
    g, u = mm(h2, p["wg"]), mm(h2, p["wu"])
    return x1 + mm(jax.nn.silu(g) * u, p["wd"])


if __name__ == "__main__":
    key = jax.random.PRNGKey(0)
    keys = jax.random.split(key, 12)

    # two packed sequences of length 8 -> total N = 16 tokens
    seq_lens = [8, 8]
    N = sum(seq_lens)
    cu_seqlens = jnp.array([0, 8, 16], dtype=jnp.int32)   # informational
    max_seqlen = max(seq_lens)                            # noqa: F841

    def w(k, shape, scale=0.05):
        return scale * jax.random.normal(k, shape, dtype=jnp.float32)

    params = dict(
        wq=w(keys[0], (HIDDEN, HIDDEN)), bq=w(keys[1], (1, HIDDEN)),
        wk=w(keys[2], (HIDDEN, HIDDEN)), bk=w(keys[3], (1, HIDDEN)),
        wv=w(keys[4], (HIDDEN, HIDDEN)), bv=w(keys[5], (1, HIDDEN)),
        wo=w(keys[6], (HIDDEN, HIDDEN)),
        wg=w(keys[7], (HIDDEN, INTERMEDIATE)),
        wu=w(keys[8], (HIDDEN, INTERMEDIATE)),
        wd=w(keys[9], (INTERMEDIATE, HIDDEN)),
        ln1=jnp.ones((1, HIDDEN), jnp.float32),
        ln2=jnp.ones((1, HIDDEN), jnp.float32),
    )

    x = jax.random.normal(keys[10], (N, HIDDEN), dtype=jnp.float32)

    # per-token segment ids / in-sequence positions (derived from cu_seqlens)
    seg = jnp.concatenate(
        [jnp.full((L,), i, jnp.int32) for i, L in enumerate(seq_lens)])
    pos = jnp.concatenate([jnp.arange(L, dtype=jnp.float32) for L in seq_lens])

    # RoPE tables, shape (N, head_dim)
    inv_freq = 1.0 / (10000.0 ** (jnp.arange(0, HEAD_DIM, 2, dtype=jnp.float32)
                                  / HEAD_DIM))
    freqs = pos[:, None] * inv_freq[None, :]
    emb = jnp.concatenate([freqs, freqs], axis=-1)
    pos_cos, pos_sin = jnp.cos(emb), jnp.sin(emb)

    # one-time weight prep (outside the per-call hot path)
    prepped = jax.tree_util.tree_map(jax.block_until_ready,
                                     prepare_encoder_params(params))

    out = encoder_layer_jit(x, pos_cos, pos_sin, seg, prepped)
    out = jax.block_until_ready(out)

    ref = _reference(x, pos_cos, pos_sin, seg, params)
    assert out.shape == (N, HIDDEN) and out.dtype == jnp.float32
    assert jnp.allclose(out, ref, atol=1e-2, rtol=1e-2), \
        "mismatch vs pure-JAX reference"
    print("KERNEL_OK")
</pallas_src>

<mosaic_0001>
module attributes {stable_mosaic.version = 11 : i64} {
  func.func @encoder_layer_kernel(%arg0: memref<16x32xf32, #tpu.memory_space<vmem>>, %arg1: memref<16x32xf32, #tpu.memory_space<vmem>>, %arg2: memref<16x32xf32, #tpu.memory_space<vmem>>, %arg3: memref<16x32xf32, #tpu.memory_space<vmem>>, %arg4: memref<16x1xi32, #tpu.memory_space<vmem>>, %arg5: memref<1x16xi32, #tpu.memory_space<vmem>>, %arg6: memref<32x96xbf16, #tpu.memory_space<vmem>>, %arg7: memref<1x96xf32, #tpu.memory_space<vmem>>, %arg8: memref<32x32xbf16, #tpu.memory_space<vmem>>, %arg9: memref<32x128xbf16, #tpu.memory_space<vmem>>, %arg10: memref<64x32xbf16, #tpu.memory_space<vmem>>, %arg11: memref<1x32xf32, #tpu.memory_space<vmem>>, %arg12: memref<1x32xf32, #tpu.memory_space<vmem>>, %arg13: memref<16x32xf32, #tpu.memory_space<vmem>>) attributes {dimension_semantics = [], scalar_prefetch = 0 : i64, scratch_operands = 0 : i64, tpu.core_type = #tpu.core_type<tc>} {
    %c0 = arith.constant 0 : index
    %c0_0 = arith.constant 0 : index
    %0 = vector.load %arg0[%c0, %c0_0] : memref<16x32xf32, #tpu.memory_space<vmem>>, vector<16x32xf32>
    %1 = arith.mulf %0, %0 : vector<16x32xf32>
    %cst = arith.constant dense<0.000000e+00> : vector<16xf32>
    %2 = vector.multi_reduction <add>, %1, %cst [1] : vector<16x32xf32> to vector<16xf32>
    %3 = vector.shape_cast %2 : vector<16xf32> to vector<16x1xf32>
    %cst_1 = arith.constant 3.200000e+01 : f32
    %4 = vector.broadcast %cst_1 : f32 to vector<16x1xf32>
    %5 = arith.divf %3, %4 : vector<16x1xf32>
    %cst_2 = arith.constant 9.99999997E-7 : f32
    %6 = vector.broadcast %cst_2 : f32 to vector<16x1xf32>
    %7 = arith.addf %5, %6 : vector<16x1xf32>
    %8 = math.rsqrt %7 : vector<16x1xf32>
    %9 = vector.broadcast %8 : vector<16x1xf32> to vector<16x32xf32>
    %10 = arith.mulf %0, %9 : vector<16x32xf32>
    %c0_3 = arith.constant 0 : index
    %c0_4 = arith.constant 0 : index
    %11 = vector.load %arg11[%c0_3, %c0_4] : memref<1x32xf32, #tpu.memory_space<vmem>>, vector<1x32xf32>
    %12 = vector.broadcast %11 : vector<1x32xf32> to vector<16x32xf32>
    %13 = arith.mulf %10, %12 : vector<16x32xf32>
    %14 = arith.truncf %13 : vector<16x32xf32> to vector<16x32xbf16>
    %c0_5 = arith.constant 0 : index
    %c0_6 = arith.constant 0 : index
    %15 = vector.load %arg6[%c0_5, %c0_6] : memref<32x96xbf16, #tpu.memory_space<vmem>>, vector<32x96xbf16>
    %cst_7 = arith.constant dense<0.000000e+00> : vector<16x96xf32>
    %16 = tpu.matmul %14, %15, %cst_7 {dimension_numbers = #tpu.dot_dimension_numbers<[1], [0], [0], [1], [0, 0, 1, 1], [], []>} : vector<16x32xbf16>, vector<32x96xbf16>, vector<16x96xf32> -> vector<16x96xf32>
    %c0_8 = arith.constant 0 : index
    %c0_9 = arith.constant 0 : index
    %17 = vector.load %arg7[%c0_8, %c0_9] : memref<1x96xf32, #tpu.memory_space<vmem>>, vector<1x96xf32>
    %18 = vector.broadcast %17 : vector<1x96xf32> to vector<16x96xf32>
    %19 = arith.addf %16, %18 : vector<16x96xf32>
    %20 = vector.extract_strided_slice %19 {offsets = [0, 0], sizes = [16, 32], strides = [1, 1]} : vector<16x96xf32> to vector<16x32xf32>
    %21 = vector.extract_strided_slice %19 {offsets = [0, 32], sizes = [16, 32], strides = [1, 1]} : vector<16x96xf32> to vector<16x32xf32>
    %22 = vector.extract_strided_slice %19 {offsets = [0, 64], sizes = [16, 32], strides = [1, 1]} : vector<16x96xf32> to vector<16x32xf32>
    %c0_10 = arith.constant 0 : index
    %c0_11 = arith.constant 0 : index
    %23 = vector.load %arg1[%c0_10, %c0_11] : memref<16x32xf32, #tpu.memory_space<vmem>>, vector<16x32xf32>
    %c0_12 = arith.constant 0 : index
    %c0_13 = arith.constant 0 : index
    %24 = vector.load %arg2[%c0_12, %c0_13] : memref<16x32xf32, #tpu.memory_space<vmem>>, vector<16x32xf32>
    %c0_14 = arith.constant 0 : index
    %c0_15 = arith.constant 0 : index
    %25 = vector.load %arg3[%c0_14, %c0_15] : memref<16x32xf32, #tpu.memory_space<vmem>>, vector<16x32xf32>
    %26 = vector.extract_strided_slice %20 {offsets = [0, 4], sizes = [16, 28], strides = [1, 1]} : vector<16x32xf32> to vector<16x28xf32>
    %27 = vector.extract_strided_slice %20 {offsets = [0, 0], sizes = [16, 4], strides = [1, 1]} : vector<16x32xf32> to vector<16x4xf32>
    %28 = tpu.concatenate %26, %27 in 1 : vector<16x28xf32>, vector<16x4xf32> -> vector<16x32xf32>
    %29 = vector.extract_strided_slice %20 {offsets = [0, 28], sizes = [16, 4], strides = [1, 1]} : vector<16x32xf32> to vector<16x4xf32>
    %30 = vector.extract_strided_slice %20 {offsets = [0, 0], sizes = [16, 28], strides = [1, 1]} : vector<16x32xf32> to vector<16x28xf32>
    %31 = tpu.concatenate %29, %30 in 1 : vector<16x4xf32>, vector<16x28xf32> -> vector<16x32xf32>
    %32 = arith.mulf %20, %23 : vector<16x32xf32>
    %33 = arith.mulf %28, %24 : vector<16x32xf32>
    %34 = arith.addf %32, %33 : vector<16x32xf32>
    %35 = arith.mulf %31, %25 : vector<16x32xf32>
    %36 = arith.addf %34, %35 : vector<16x32xf32>
    %37 = vector.extract_strided_slice %21 {offsets = [0, 4], sizes = [16, 28], strides = [1, 1]} : vector<16x32xf32> to vector<16x28xf32>
    %38 = vector.extract_strided_slice %21 {offsets = [0, 0], sizes = [16, 4], strides = [1, 1]} : vector<16x32xf32> to vector<16x4xf32>
    %39 = tpu.concatenate %37, %38 in 1 : vector<16x28xf32>, vector<16x4xf32> -> vector<16x32xf32>
    %40 = vector.extract_strided_slice %21 {offsets = [0, 28], sizes = [16, 4], strides = [1, 1]} : vector<16x32xf32> to vector<16x4xf32>
    %41 = vector.extract_strided_slice %21 {offsets = [0, 0], sizes = [16, 28], strides = [1, 1]} : vector<16x32xf32> to vector<16x28xf32>
    %42 = tpu.concatenate %40, %41 in 1 : vector<16x4xf32>, vector<16x28xf32> -> vector<16x32xf32>
    %43 = arith.mulf %21, %23 : vector<16x32xf32>
    %44 = arith.mulf %39, %24 : vector<16x32xf32>
    %45 = arith.addf %43, %44 : vector<16x32xf32>
    %46 = arith.mulf %42, %25 : vector<16x32xf32>
    %47 = arith.addf %45, %46 : vector<16x32xf32>
    %c0_16 = arith.constant 0 : index
    %c0_17 = arith.constant 0 : index
    %48 = vector.load %arg4[%c0_16, %c0_17] : memref<16x1xi32, #tpu.memory_space<vmem>>, vector<16x1xi32>
    %c0_18 = arith.constant 0 : index
    %c0_19 = arith.constant 0 : index
    %49 = vector.load %arg5[%c0_18, %c0_19] : memref<1x16xi32, #tpu.memory_space<vmem>>, vector<1x16xi32>
    %50 = vector.broadcast %48 : vector<16x1xi32> to vector<16x16xi32>
    %51 = vector.broadcast %49 : vector<1x16xi32> to vector<16x16xi32>
    %52 = arith.cmpi eq, %50, %51 : vector<16x16xi32>
    %53 = vector.extract_strided_slice %36 {offsets = [0, 0], sizes = [16, 8], strides = [1, 1]} : vector<16x32xf32> to vector<16x8xf32>
    %54 = vector.extract_strided_slice %47 {offsets = [0, 0], sizes = [16, 8], strides = [1, 1]} : vector<16x32xf32> to vector<16x8xf32>
    %cst_20 = arith.constant dense<0.000000e+00> : vector<16x16xf32>
    %55 = tpu.matmul %53, %54, %cst_20 {dimension_numbers = #tpu.dot_dimension_numbers<[1], [1], [0], [0], [0, 0, 1, 0], [], []>} : vector<16x8xf32>, vector<16x8xf32>, vector<16x16xf32> -> vector<16x16xf32>
    %cst_21 = arith.constant -1.000000e+30 : f32
    %56 = vector.broadcast %cst_21 : f32 to vector<16x16xf32>
    %57 = arith.select %52, %55, %56 : vector<16x16xi1>, vector<16x16xf32>
    %cst_22 = arith.constant dense<0xFF800000> : vector<16xf32>
    %58 = vector.multi_reduction <maximumf>, %57, %cst_22 [1] : vector<16x16xf32> to vector<16xf32>
    %59 = vector.shape_cast %58 : vector<16xf32> to vector<16x1xf32>
    %60 = vector.broadcast %59 : vector<16x1xf32> to vector<16x16xf32>
    %61 = arith.subf %57, %60 : vector<16x16xf32>
    %62 = math.exp %61 : vector<16x16xf32>
    %cst_23 = arith.constant dense<0.000000e+00> : vector<16xf32>
    %63 = vector.multi_reduction <add>, %62, %cst_23 [1] : vector<16x16xf32> to vector<16xf32>
    %64 = vector.shape_cast %63 : vector<16xf32> to vector<16x1xf32>
    %65 = arith.truncf %62 : vector<16x16xf32> to vector<16x16xbf16>
    %66 = vector.extract_strided_slice %22 {offsets = [0, 0], sizes = [16, 8], strides = [1, 1]} : vector<16x32xf32> to vector<16x8xf32>
    %67 = arith.truncf %66 : vector<16x8xf32> to vector<16x8xbf16>
    %cst_24 = arith.constant dense<0.000000e+00> : vector<16x8xf32>
    %68 = tpu.matmul %65, %67, %cst_24 {dimension_numbers = #tpu.dot_dimension_numbers<[1], [0], [0], [1], [0, 0, 1, 1], [], []>} : vector<16x16xbf16>, vector<16x8xbf16>, vector<16x8xf32> -> vector<16x8xf32>
    %69 = tpu.reciprocal %64 {approx = true} : vector<16x1xf32> -> vector<16x1xf32>
    %70 = vector.broadcast %69 : vector<16x1xf32> to vector<16x8xf32>
    %71 = arith.mulf %68, %70 : vector<16x8xf32>
    %72 = vector.extract_strided_slice %36 {offsets = [0, 8], sizes = [16, 8], strides = [1, 1]} : vector<16x32xf32> to vector<16x8xf32>
    %73 = vector.extract_strided_slice %47 {offsets = [0, 8], sizes = [16, 8], strides = [1, 1]} : vector<16x32xf32> to vector<16x8xf32>
    %cst_25 = arith.constant dense<0.000000e+00> : vector<16x16xf32>
    %74 = tpu.matmul %72, %73, %cst_25 {dimension_numbers = #tpu.dot_dimension_numbers<[1], [1], [0], [0], [0, 0, 1, 0], [], []>} : vector<16x8xf32>, vector<16x8xf32>, vector<16x16xf32> -> vector<16x16xf32>
    %cst_26 = arith.constant -1.000000e+30 : f32
    %75 = vector.broadcast %cst_26 : f32 to vector<16x16xf32>
    %76 = arith.select %52, %74, %75 : vector<16x16xi1>, vector<16x16xf32>
    %cst_27 = arith.constant dense<0xFF800000> : vector<16xf32>
    %77 = vector.multi_reduction <maximumf>, %76, %cst_27 [1] : vector<16x16xf32> to vector<16xf32>
    %78 = vector.shape_cast %77 : vector<16xf32> to vector<16x1xf32>
    %79 = vector.broadcast %78 : vector<16x1xf32> to vector<16x16xf32>
    %80 = arith.subf %76, %79 : vector<16x16xf32>
    %81 = math.exp %80 : vector<16x16xf32>
    %cst_28 = arith.constant dense<0.000000e+00> : vector<16xf32>
    %82 = vector.multi_reduction <add>, %81, %cst_28 [1] : vector<16x16xf32> to vector<16xf32>
    %83 = vector.shape_cast %82 : vector<16xf32> to vector<16x1xf32>
    %84 = arith.truncf %81 : vector<16x16xf32> to vector<16x16xbf16>
    %85 = vector.extract_strided_slice %22 {offsets = [0, 8], sizes = [16, 8], strides = [1, 1]} : vector<16x32xf32> to vector<16x8xf32>
    %86 = arith.truncf %85 : vector<16x8xf32> to vector<16x8xbf16>
    %cst_29 = arith.constant dense<0.000000e+00> : vector<16x8xf32>
    %87 = tpu.matmul %84, %86, %cst_29 {dimension_numbers = #tpu.dot_dimension_numbers<[1], [0], [0], [1], [0, 0, 1, 1], [], []>} : vector<16x16xbf16>, vector<16x8xbf16>, vector<16x8xf32> -> vector<16x8xf32>
    %88 = tpu.reciprocal %83 {approx = true} : vector<16x1xf32> -> vector<16x1xf32>
    %89 = vector.broadcast %88 : vector<16x1xf32> to vector<16x8xf32>
    %90 = arith.mulf %87, %89 : vector<16x8xf32>
    %91 = vector.extract_strided_slice %36 {offsets = [0, 16], sizes = [16, 8], strides = [1, 1]} : vector<16x32xf32> to vector<16x8xf32>
    %92 = vector.extract_strided_slice %47 {offsets = [0, 16], sizes = [16, 8], strides = [1, 1]} : vector<16x32xf32> to vector<16x8xf32>
    %cst_30 = arith.constant dense<0.000000e+00> : vector<16x16xf32>
    %93 = tpu.matmul %91, %92, %cst_30 {dimension_numbers = #tpu.dot_dimension_numbers<[1], [1], [0], [0], [0, 0, 1, 0], [], []>} : vector<16x8xf32>, vector<16x8xf32>, vector<16x16xf32> -> vector<16x16xf32>
    %cst_31 = arith.constant -1.000000e+30 : f32
    %94 = vector.broadcast %cst_31 : f32 to vector<16x16xf32>
    %95 = arith.select %52, %93, %94 : vector<16x16xi1>, vector<16x16xf32>
    %cst_32 = arith.constant dense<0xFF800000> : vector<16xf32>
    %96 = vector.multi_reduction <maximumf>, %95, %cst_32 [1] : vector<16x16xf32> to vector<16xf32>
    %97 = vector.shape_cast %96 : vector<16xf32> to vector<16x1xf32>
    %98 = vector.broadcast %97 : vector<16x1xf32> to vector<16x16xf32>
    %99 = arith.subf %95, %98 : vector<16x16xf32>
    %100 = math.exp %99 : vector<16x16xf32>
    %cst_33 = arith.constant dense<0.000000e+00> : vector<16xf32>
    %101 = vector.multi_reduction <add>, %100, %cst_33 [1] : vector<16x16xf32> to vector<16xf32>
    %102 = vector.shape_cast %101 : vector<16xf32> to vector<16x1xf32>
    %103 = arith.truncf %100 : vector<16x16xf32> to vector<16x16xbf16>
    %104 = vector.extract_strided_slice %22 {offsets = [0, 16], sizes = [16, 8], strides = [1, 1]} : vector<16x32xf32> to vector<16x8xf32>
    %105 = arith.truncf %104 : vector<16x8xf32> to vector<16x8xbf16>
    %cst_34 = arith.constant dense<0.000000e+00> : vector<16x8xf32>
    %106 = tpu.matmul %103, %105, %cst_34 {dimension_numbers = #tpu.dot_dimension_numbers<[1], [0], [0], [1], [0, 0, 1, 1], [], []>} : vector<16x16xbf16>, vector<16x8xbf16>, vector<16x8xf32> -> vector<16x8xf32>
    %107 = tpu.reciprocal %102 {approx = true} : vector<16x1xf32> -> vector<16x1xf32>
    %108 = vector.broadcast %107 : vector<16x1xf32> to vector<16x8xf32>
    %109 = arith.mulf %106, %108 : vector<16x8xf32>
    %110 = vector.extract_strided_slice %36 {offsets = [0, 24], sizes = [16, 8], strides = [1, 1]} : vector<16x32xf32> to vector<16x8xf32>
    %111 = vector.extract_strided_slice %47 {offsets = [0, 24], sizes = [16, 8], strides = [1, 1]} : vector<16x32xf32> to vector<16x8xf32>
    %cst_35 = arith.constant dense<0.000000e+00> : vector<16x16xf32>
    %112 = tpu.matmul %110, %111, %cst_35 {dimension_numbers = #tpu.dot_dimension_numbers<[1], [1], [0], [0], [0, 0, 1, 0], [], []>} : vector<16x8xf32>, vector<16x8xf32>, vector<16x16xf32> -> vector<16x16xf32>
    %cst_36 = arith.constant -1.000000e+30 : f32
    %113 = vector.broadcast %cst_36 : f32 to vector<16x16xf32>
    %114 = arith.select %52, %112, %113 : vector<16x16xi1>, vector<16x16xf32>
    %cst_37 = arith.constant dense<0xFF800000> : vector<16xf32>
    %115 = vector.multi_reduction <maximumf>, %114, %cst_37 [1] : vector<16x16xf32> to vector<16xf32>
    %116 = vector.shape_cast %115 : vector<16xf32> to vector<16x1xf32>
    %117 = vector.broadcast %116 : vector<16x1xf32> to vector<16x16xf32>
    %118 = arith.subf %114, %117 : vector<16x16xf32>
    %119 = math.exp %118 : vector<16x16xf32>
    %cst_38 = arith.constant dense<0.000000e+00> : vector<16xf32>
    %120 = vector.multi_reduction <add>, %119, %cst_38 [1] : vector<16x16xf32> to vector<16xf32>
    %121 = vector.shape_cast %120 : vector<16xf32> to vector<16x1xf32>
    %122 = arith.truncf %119 : vector<16x16xf32> to vector<16x16xbf16>
    %123 = vector.extract_strided_slice %22 {offsets = [0, 24], sizes = [16, 8], strides = [1, 1]} : vector<16x32xf32> to vector<16x8xf32>
    %124 = arith.truncf %123 : vector<16x8xf32> to vector<16x8xbf16>
    %cst_39 = arith.constant dense<0.000000e+00> : vector<16x8xf32>
    %125 = tpu.matmul %122, %124, %cst_39 {dimension_numbers = #tpu.dot_dimension_numbers<[1], [0], [0], [1], [0, 0, 1, 1], [], []>} : vector<16x16xbf16>, vector<16x8xbf16>, vector<16x8xf32> -> vector<16x8xf32>
    %126 = tpu.reciprocal %121 {approx = true} : vector<16x1xf32> -> vector<16x1xf32>
    %127 = vector.broadcast %126 : vector<16x1xf32> to vector<16x8xf32>
    %128 = arith.mulf %125, %127 : vector<16x8xf32>
    %129 = tpu.concatenate %71, %90, %109, %128 in 1 : vector<16x8xf32>, vector<16x8xf32>, vector<16x8xf32>, vector<16x8xf32> -> vector<16x32xf32>
    %130 = arith.truncf %129 : vector<16x32xf32> to vector<16x32xbf16>
    %c0_40 = arith.constant 0 : index
    %c0_41 = arith.constant 0 : index
    %131 = vector.load %arg8[%c0_40, %c0_41] : memref<32x32xbf16, #tpu.memory_space<vmem>>, vector<32x32xbf16>
    %cst_42 = arith.constant dense<0.000000e+00> : vector<16x32xf32>
    %132 = tpu.matmul %130, %131, %cst_42 {dimension_numbers = #tpu.dot_dimension_numbers<[1], [0], [0], [1], [0, 0, 1, 1], [], []>} : vector<16x32xbf16>, vector<32x32xbf16>, vector<16x32xf32> -> vector<16x32xf32>
    %133 = arith.addf %0, %132 : vector<16x32xf32>
    %134 = arith.mulf %133, %133 : vector<16x32xf32>
    %cst_43 = arith.constant dense<0.000000e+00> : vector<16xf32>
    %135 = vector.multi_reduction <add>, %134, %cst_43 [1] : vector<16x32xf32> to vector<16xf32>
    %136 = vector.shape_cast %135 : vector<16xf32> to vector<16x1xf32>
    %cst_44 = arith.constant 3.200000e+01 : f32
    %137 = vector.broadcast %cst_44 : f32 to vector<16x1xf32>
    %138 = arith.divf %136, %137 : vector<16x1xf32>
    %cst_45 = arith.constant 9.99999997E-7 : f32
    %139 = vector.broadcast %cst_45 : f32 to vector<16x1xf32>
    %140 = arith.addf %138, %139 : vector<16x1xf32>
    %141 = math.rsqrt %140 : vector<16x1xf32>
    %142 = vector.broadcast %141 : vector<16x1xf32> to vector<16x32xf32>
    %143 = arith.mulf %133, %142 : vector<16x32xf32>
    %c0_46 = arith.constant 0 : index
    %c0_47 = arith.constant 0 : index
    %144 = vector.load %arg12[%c0_46, %c0_47] : memref<1x32xf32, #tpu.memory_space<vmem>>, vector<1x32xf32>
    %145 = vector.broadcast %144 : vector<1x32xf32> to vector<16x32xf32>
    %146 = arith.mulf %143, %145 : vector<16x32xf32>
    %147 = arith.truncf %146 : vector<16x32xf32> to vector<16x32xbf16>
    %c0_48 = arith.constant 0 : index
    %c0_49 = arith.constant 0 : index
    %148 = vector.load %arg9[%c0_48, %c0_49] : memref<32x128xbf16, #tpu.memory_space<vmem>>, vector<32x128xbf16>
    %cst_50 = arith.constant dense<0.000000e+00> : vector<16x128xf32>
    %149 = tpu.matmul %147, %148, %cst_50 {dimension_numbers = #tpu.dot_dimension_numbers<[1], [0], [0], [1], [0, 0, 1, 1], [], []>} : vector<16x32xbf16>, vector<32x128xbf16>, vector<16x128xf32> -> vector<16x128xf32>
    %150 = vector.extract_strided_slice %149 {offsets = [0, 0], sizes = [16, 64], strides = [1, 1]} : vector<16x128xf32> to vector<16x64xf32>
    %151 = vector.extract_strided_slice %149 {offsets = [0, 64], sizes = [16, 64], strides = [1, 1]} : vector<16x128xf32> to vector<16x64xf32>
    %cst_51 = arith.constant 0.000000e+00 : f32
    %152 = vector.broadcast %cst_51 : f32 to vector<16x64xf32>
    %153 = arith.subf %152, %150 : vector<16x64xf32>
    %154 = math.exp %153 : vector<16x64xf32>
    %cst_52 = arith.constant 1.000000e+00 : f32
    %155 = vector.broadcast %cst_52 : f32 to vector<16x64xf32>
    %156 = arith.addf %155, %154 : vector<16x64xf32>
    %cst_53 = arith.constant 1.000000e+00 : f32
    %157 = vector.broadcast %cst_53 : f32 to vector<16x64xf32>
    %158 = arith.divf %157, %156 : vector<16x64xf32>
    %159 = arith.mulf %150, %158 : vector<16x64xf32>
    %160 = arith.mulf %159, %151 : vector<16x64xf32>
    %161 = arith.truncf %160 : vector<16x64xf32> to vector<16x64xbf16>
    %c0_54 = arith.constant 0 : index
    %c0_55 = arith.constant 0 : index
    %162 = vector.load %arg10[%c0_54, %c0_55] : memref<64x32xbf16, #tpu.memory_space<vmem>>, vector<64x32xbf16>
    %cst_56 = arith.constant dense<0.000000e+00> : vector<16x32xf32>
    %163 = tpu.matmul %161, %162, %cst_56 {dimension_numbers = #tpu.dot_dimension_numbers<[1], [0], [0], [1], [0, 0, 1, 1], [], []>} : vector<16x64xbf16>, vector<64x32xbf16>, vector<16x32xf32> -> vector<16x32xf32>
    %164 = arith.addf %133, %163 : vector<16x32xf32>
    %c0_57 = arith.constant 0 : index
    %c0_58 = arith.constant 0 : index
    %165 = vector.load %arg13[%c0_57, %c0_58] : memref<16x32xf32, #tpu.memory_space<vmem>>, vector<16x32xf32>
    tpu.vector_store %arg13[%c0_57, %c0_58], %164 {strides = array<i32>} : memref<16x32xf32, #tpu.memory_space<vmem>>, vector<16x32xf32>,
    return
  }
}

</mosaic_0001>

<bundles_post_ra>
// kernel: encoder_layer.1
= control target key start
LH: loop header
LB: loop body
LE: loop exit
PB: predicated region body
PF: predicated region fallthrough
CT: control target
= control target key end

     0   :  { %vm50_vm0 = vcmask 261120   ;;  %s1908_s0 = inlined_call_operand.vmem [shape: f32[16,32], index: 0, kind: input, shape index: {}]   ;;  %s1909_s1 = inlined_call_operand.vmem [shape: f32[16,32], index: 1, kind: input, shape index: {}]   ;;  %s1910_s2 = inlined_call_operand.vmem [shape: f32[16,32], index: 2, kind: input, shape index: {}]   ;;  %s1911_s3 = inlined_call_operand.vmem [shape: f32[16,32], index: 3, kind: input, shape index: {}]   ;;  %s1912_s4 = inlined_call_operand.vmem [shape: s32[16,1], index: 4, kind: input, shape index: {}]   ;;  %s1913_s5 = inlined_call_operand.vmem [shape: s32[1,16], index: 5, kind: input, shape index: {}]   ;;  %s1914_s6 = inlined_call_operand.vmem [shape: bf16[32,96], index: 6, kind: input, shape index: {}]   ;;  %s1915_s7 = inlined_call_operand.vmem [shape: f32[1,96], index: 7, kind: input, shape index: {}]   ;;  %s1916_s8 = inlined_call_operand.vmem [shape: bf16[32,32], index: 8, kind: input, shape index: {}]   ;;  %s1917_s9 = inlined_call_operand.vmem [shape: bf16[32,128], index: 9, kind: input, shape index: {}]   ;;  %s1918_s10 = inlined_call_operand.vmem [shape: bf16[64,32], index: 10, kind: input, shape index: {}]   ;;  %s1919_s11 = inlined_call_operand.vmem [shape: f32[1,32], index: 11, kind: input, shape index: {}]   ;;  %s1920_s12 = inlined_call_operand.vmem [shape: f32[1,32], index: 12, kind: input, shape index: {}]   ;;  %s1921_s13 = inlined_call_operand.hbm [shape: f32[16,32], index: 13, kind: output, shape index: {}]  }
   0x1   :  { %v1600_v0 = vld [vmem:[%s1908_s0] sm:$0xff]  ;;  %v1605_v1 = vld [vmem:[%s1908_s0 + $0x8] sm:$0xff] }
   0x2   :  { %v48_v2 = vmul.f32 %v1600_v0, %v1600_v0  ;;  %v49_v3 = vmul.f32 %v1605_v1, %v1605_v1 }
   0x4   :  { %v51_v4 = vsel %vm50_vm0, %v48_v2, 0.0  ;;  %v54_v5 = vsel %vm50_vm0, %v49_v3, 0.0 }
   0x5   :  { %52 = vadd.xlane.f32.xlu0 %v51_v4 }
   0x6   :  { %18 = vsyncpa [#allocation3], 0  ;;  %v1421_v6 = vld [vmem:[%s1914_s6 + $0x8] sm:$0xff]   ;;  %v1501_v7 = vmov 0.0   ;;  %vm1502_vm1 = vmmov 0   ;;  %v1422_v8 = vld [vmem:[%s1914_s6] sm:$0xff]  }
   0x7   :  { %1290 = vmatprep.subr.bf16.mxu0 %v1501_v7  ;;  %1294 = vmatprep.mubr.msk.bf16.mxu0 %vm1502_vm1, %v1501_v7  ;;  %v1214_v18 = vld [vmem:[%s1919_s11] ss:$0 sm:$0xff]  ;;  %s1503_s18 = smov 100   ;;  %s1504_s11 = smov 124   ;;  %v144_v30 = vld [vmem:[%s1909_s1 + $0x8] sm:$0xff]  ;;  %vm163_vm2 = vcmask 228352  }
   0x8   :  { %1291 = vmatpush3.bf16.msra.mxu0 %v1421_v6  ;;  %v1215_v25 = vld [vmem:[%s1915_s7] ss:$0 sm:$0xff]  ;;  %s1505_s19 = smov 28   ;;  %s1506_s20 = smov 92   ;;  %v146_v34 = vld [vmem:[%s1910_s2 + $0x8] sm:$0xff]  ;;  %vm178_vm3 = vcmask 31744  }
   0x9   :  { %55 = vadd.xlane.f32.xlu0 %v54_v5  ;;  %1292 = vmatprep.subr.bf16.mxu0 %v1501_v7  ;;  %s1507_s7 = smov 68   ;;  %s1508_s23 = smov 32   ;;  %v143_v31 = vld [vmem:[%s1909_s1] sm:$0xff]  ;;  %v148_v49 = vld [vmem:[%s1911_s3 + $0x8] sm:$0xff]  ;;  %v1510_v54 = vmov 0   ;;  %vm262_vm4 = vcmask 64512  }
   0xa   :  { %v145_v38 = vld [vmem:[%s1910_s2] sm:$0xff]  ;;  %s1509_s30 = smov 4   ;;  %1404 = vset.pattern.permute.xlu1 %v1510_v54  ;;  %1405 = vset.pattern.permute.xlu0 %v1510_v54  ;;  %s1512_s15 = smov 96   ;;  %vm350_vm6 = vcmask 130048   ;;  %vm940_vm8 = vcmask 195584   ;;  %vm1149_vm9 = vcmask 523264  }
   0xb   :  { %v147_v53 = vld [vmem:[%s1911_s3] sm:$0xff]  ;;  %s1511_s3 = smov 88   ;;  %s1513_s16 = smov 120  }
   0xc   :  { %1293 = vmatpush3.bf16.msra.mxu0 %v1422_v8  ;;  %s1517_s21 = smov 72   ;;  %s1520_s24 = smov 48  }
   0xd   :  { %s1521_s25 = smov 40   ;;  %s1522_s26 = smov 8  }
   0xe   :  { %s1523_s2 = smov 16  }
  0x8e   :  { %v53_v9 = vpop.xlane.xlu0 %52 }
  0x8f   :  { %v58_v10 = vmul.f32 0.03125, %v53_v9 }
  0x91   :  { %v60_v11 = vadd.f32 1e-06, %v58_v10 }
  0x92   :  { %v56_v12 = vpop.xlane.xlu0 %55 }
  0x93   :  { %1431 = vrsqrt.f32 %v60_v11  ;;  %v59_v13 = vmul.f32 0.03125, %v56_v12 }
  0x95   :  { %v61_v14 = vadd.f32 1e-06, %v59_v13 }
  0x97   :  { %1433 = vrsqrt.f32 %v61_v14 }
  0xa0   :  { %v1432_v15 = vpop.eup %1431 }
  0xa1   :  { %v64_v16 = vmul.f32 %v1432_v15, %v1600_v0 }
  0xa3   :  { %v73_v20 = vmul.f32 %v1214_v18, %v64_v16 }
  0xa4   :  { %v1434_v17 = vpop.eup %1433 }
  0xa5   :  { %v65_v19 = vmul.f32 %v1434_v17, %v1605_v1 }
  0xa7   :  { %v74_v21 = vmul.f32 %v1214_v18, %v65_v19 }
  0xa9   :  { %v75_v22 = vpack.c.bf16 %v74_v21, %v73_v20 }
  0xab   :  { %1295 = vmatmul.mubr.msk.bf16.vlgmr.msra.gmra.mxu0 %vm50_vm0, %v75_v22  ;;  %v241_v22 = vld [vmem:[%s1912_s4] sm:$0xff] }
 0x16b   :  { %v136_v23 = vpop.f32.mrf.mxu0 }
 0x16c   :  { %v1636_v29 = vadd.f32 %v1215_v25, %v136_v23  ;;  %v242_v23 = vld [vmem:[%s1912_s4 + $0x8] sm:$0xff] }
 0x16d   :  { %v1296_v24 = vpop.f32.mrf.mxu0 }
 0x16e   :  { %v181_v42 = vmul.f32 %v143_v31, %v1636_v29 }
 0x16f   :  { %v139_v26 = vpop.f32.mrf.mxu0 }
 0x170   :  { %v1632_v27 = vadd.f32 %v1215_v25, %v139_v26 }
 0x171   :  { %v1297_v28 = vpop.f32.mrf.mxu0 }
 0x172   :  { %168 = vrot.lane.b32.xlu0 %v1632_v27, %s1503_s18  ;;  %153 = vrot.lane.b32.xlu1 %v1632_v27, %s1504_s11  ;;  %v182_v62 = vmul.f32 %v144_v30, %v1632_v27  ;;  %v1708_v24 = vpack.c.bf16 %v1632_v27, %v1636_v29 }
 0x176   :  { %157 = vrot.lane.b32.xlu0 %v1636_v29, %s1505_s19  ;;  %193 = vrot.lane.b32.xlu1 %v1632_v27, %s1506_s20 }
 0x17a   :  { %151 = vrot.lane.b32.xlu1 %v1636_v29, %s1504_s11 }
 0x17e   :  { %191 = vrot.lane.b32.xlu1 %v1636_v29, %s1506_s20  ;;  %s1515_s20 = smov 56  }
 0x182   :  { %166 = vrot.lane.b32.xlu1 %v1636_v29, %s1503_s18 }
 0x186   :  { %201 = vrot.lane.b32.xlu1 %v1632_v27, %s1507_s7 }
 0x18a   :  { %199 = vrot.lane.b32.xlu1 %v1636_v29, %s1507_s7  ;;  %s1516_s7 = smov 80  }
 0x18e   :  { %211 = vrot.lane.b32.xlu1 %v144_v30, %s1508_s23 }
 0x192   :  { %209 = vrot.lane.b32.xlu1 %v143_v31, %s1508_s23 }
 0x196   :  { %159 = vrot.lane.b32.xlu1 %v1632_v27, %s1505_s19  ;;  %s1514_s19 = smov 64  }
 0x1e4   :  { %v154_v32 = vpop.permute.xlu1 %153  ;;  %v1654_v33 = vpop.permute.xlu0 %168 }
 0x1e8   :  { %v194_v35 = vpop.permute.xlu1 %193  ;;  %v158_v39 = vpop.permute.xlu0 %157 }
 0x1e9   :  { %v198_v36 = vsel %vm163_vm2, %v194_v35, %v154_v32 }
 0x1ea   :  { %v218_v37 = vmul.f32 %v198_v36, %v146_v34 }
 0x1ec   :  { %223 = vrot.lane.b32.xlu0 %v218_v37, %s1508_s23  ;;  %v152_v40 = vpop.permute.xlu1 %151  ;;  %v1742_v37 = vld [vmem:[%s1913_s5] ss:$0 sm:$0xff]  ;;  %s1518_s5 = smov 112  }
 0x1ed   :  { %v164_v41 = vsel %vm163_vm2, %v152_v40, %v158_v39 }
 0x1ee   :  { %v183_v43 = vmul.f32 %v164_v41, %v145_v38 }
 0x1f0   :  { %v185_v44 = vadd.f32 %v183_v43, %v181_v42  ;;  %v192_v45 = vpop.permute.xlu1 %191 }
 0x1f1   :  { %v197_v46 = vsel %vm163_vm2, %v192_v45, %v152_v40 }
 0x1f2   :  { %v217_v47 = vmul.f32 %v197_v46, %v145_v38 }
 0x1f4   :  { %221 = vrot.lane.b32.xlu1 %v217_v47, %s1508_s23  ;;  %v167_v48 = vpop.permute.xlu1 %166 }
 0x1f8   :  { %172 = vrot.lane.b32.xlu1 %v1636_v29, %s1509_s30  ;;  %v202_v50 = vpop.permute.xlu1 %201 }
 0x1f9   :  { %v206_v51 = vsel %vm178_vm3, %v202_v50, %v1654_v33 }
 0x1fa   :  { %v230_v52 = vmul.f32 %v206_v51, %v148_v49 }
 0x1fc   :  { %235 = vrot.lane.b32.xlu0 %v230_v52, %s1508_s23  ;;  %v200_v55 = vpop.permute.xlu1 %199 }
 0x1fd   :  { %v205_v56 = vsel %vm178_vm3, %v200_v55, %v167_v48 }
 0x1fe   :  { %v229_v57 = vmul.f32 %v205_v56, %v147_v53 }
 0x200   :  { %233 = vrot.lane.b32.xlu0 %v229_v57, %s1508_s23  ;;  %v212_v58 = vpop.permute.xlu1 %211  ;;  %s1519_s23 = smov 104  }
 0x201   :  { %v216_v6 = vmul.f32 %v212_v58, %v1632_v27 }
 0x204   :  { %174 = vrot.lane.b32.xlu0 %v1632_v27, %s1509_s30  ;;  %v210_v59 = vpop.permute.xlu1 %209 }
 0x205   :  { %v215_v13 = vmul.f32 %v210_v59, %v1636_v29 }
 0x208   :  { %v160_v60 = vpop.permute.xlu1 %159 }
 0x209   :  { %v165_v61 = vsel %vm163_vm2, %v154_v32, %v160_v60 }
 0x20a   :  { %v184_v63 = vmul.f32 %v165_v61, %v146_v34 }
 0x20c   :  { %v186_v2 = vadd.f32 %v184_v63, %v182_v62 }
 0x25e   :  { %v224_v4 = vpop.permute.xlu0 %223 }
 0x25f   :  { %v228_v10 = vadd.f32 %v224_v4, %v216_v6 }
 0x266   :  { %v222_v3 = vpop.permute.xlu1 %221 }
 0x267   :  { %v227_v15 = vadd.f32 %v222_v3, %v215_v13 }
 0x26a   :  { %v173_v5 = vpop.permute.xlu1 %172 }
 0x26b   :  { %v179_v8 = vsel %vm178_vm3, %v167_v48, %v173_v5 }
 0x26c   :  { %v187_v9 = vmul.f32 %v179_v8, %v147_v53 }
 0x26e   :  { %v1685_v11 = vadd.f32 %v187_v9, %v185_v44  ;;  %v236_v12 = vpop.permute.xlu0 %235 }
 0x26f   :  { %v240_v14 = vadd.f32 %v236_v12, %v228_v10 }
 0x270   :  { %1302 = vmatprep.mubr.msk.f32.mxu1 %vm262_vm4, %v1685_v11 }
 0x271   :  { %429 = vrot.lane.b32.xlu0 %v240_v14, %s1511_s3  ;;  %260 = vrot.lane.b32.xlu1 %v240_v14, %s1512_s15 }
 0x272   :  { %v234_v16 = vpop.permute.xlu0 %233 }
 0x273   :  { %v1690_v17 = vadd.f32 %v234_v16, %v227_v15 }
 0x275   :  { %427 = vrot.lane.b32.xlu0 %v1690_v17, %s1511_s3  ;;  %258 = vrot.lane.b32.xlu1 %v1690_v17, %s1512_s15 }
 0x276   :  { %v175_v18 = vpop.permute.xlu0 %174 }
 0x277   :  { %v180_v19 = vsel %vm178_vm3, %v1654_v33, %v175_v18 }
 0x278   :  { %v188_v20 = vmul.f32 %v180_v19, %v148_v49 }
 0x279   :  { %423 = vrot.lane.b32.xlu1 %v1685_v11, %s1513_s16 }
 0x27a   :  { %v1697_v21 = vadd.f32 %v188_v20, %v186_v2 }
 0x27c   :  { %425 = vrot.lane.b32.xlu0 %v1697_v21, %s1513_s16 }
 0x27d   :  { %245 = vperm.xlu1 %1404, %v241_v22  }
 0x280   :  { %248 = vperm.xlu0 %1405, %v242_v23  }
 0x281   :  { %372 = vrot.lane.b32.xlu1 %v1708_v24, %s1514_s19 }
 0x284   :  { %535 = vrot.lane.b32.xlu0 %v1708_v24, %s1515_s20 }
 0x285   :  { %592 = vrot.lane.b32.xlu1 %v240_v14, %s1516_s7 }
 0x289   :  { %755 = vrot.lane.b32.xlu1 %v240_v14, %s1517_s21 }
 0x28d   :  { %753 = vrot.lane.b32.xlu1 %v1690_v17, %s1517_s21 }
 0x2e3   :  { %v430_v25 = vpop.permute.xlu0 %429  ;;  %v261_v26 = vpop.permute.xlu1 %260 }
 0x2e4   :  { %1298 = vmatprep.subr.msk.mxu1 %vm262_vm4, %v261_v26  ;;  %1311 = vmatprep.subr.msk.mxu0 %vm262_vm4, %v430_v25 }
 0x2e5   :  { %1299 = vmatpush3.xpose.msk.msra.mxu1 %vm262_vm4, %v261_v26  ;;  %1312 = vmatpush3.xpose.msk.msra.mxu0 %vm262_vm4, %v430_v25 }
 0x2e7   :  { %v428_v27 = vpop.permute.xlu0 %427  ;;  %v259_v28 = vpop.permute.xlu1 %258 }
 0x2e8   :  { %1300 = vmatprep.subr.msk.mxu1 %vm262_vm4, %v259_v28  ;;  %1313 = vmatprep.subr.msk.mxu0 %vm262_vm4, %v428_v27 }
 0x2e9   :  { %1301 = vmatpush3.xpose.msk.msra.mxu1 %vm262_vm4, %v259_v28  ;;  %1314 = vmatpush3.xpose.msk.msra.mxu0 %vm262_vm4, %v428_v27 }
 0x2ea   :  { %1305 = vmatprep.subr.bf16.mxu1 %v1501_v7  ;;  %1318 = vmatprep.subr.bf16.mxu0 %v1501_v7 }
 0x2eb   :  { %v424_v29 = vpop.permute.xlu1 %423 }
 0x2ec   :  { %1303 = vmatmul.mubr.msk.f32.vlgmr.msra.gmra.mxu1 %vm262_vm4, %v1697_v21  ;;  %1315 = vmatprep.mubr.msk.f32.mxu0 %vm262_vm4, %v424_v29 }
 0x2ed   :  { %1307 = vmatprep.mubr.msk.bf16.mxu1 %vm1502_vm1, %v1501_v7 }
 0x2ee   :  { %v426_v30 = vpop.permute.xlu0 %425 }
 0x2ef   :  { %1316 = vmatmul.mubr.msk.f32.vlgmr.msra.gmra.mxu0 %vm262_vm4, %v426_v30 }
 0x2f0   :  { %1320 = vmatprep.mubr.msk.bf16.mxu0 %vm1502_vm1, %v1501_v7 }
 0x2f8   :  { %v1733_v31 = vpop.permute.xlu1 %245 }
 0x2f9   :  { %vm254_vm7 = vcmp.eq.s32.totalorder %v1733_v31, %v1742_v37 }
 0x2fb   :  { %v1735_v32 = vpop.permute.xlu0 %248 }
 0x2fc   :  { %v373_v33 = vpop.permute.xlu1 %372  ;;  %vm255_vm5 = vcmp.eq.s32.totalorder %v1735_v32, %v1742_v37 }
 0x2fd   :  { %1306 = vmatpush3.bf16.msra.mxu1 %v373_v33 }
 0x2ff   :  { %v536_v34 = vpop.permute.xlu0 %535 }
 0x300   :  { %v593_v35 = vpop.permute.xlu1 %592  ;;  %1319 = vmatpush3.bf16.msra.mxu0 %v536_v34 }
 0x301   :  { %1324 = vmatprep.subr.msk.mxu1 %vm262_vm4, %v593_v35 }
 0x304   :  { %v756_v36 = vpop.permute.xlu1 %755 }
 0x305   :  { %1337 = vmatprep.subr.msk.mxu0 %vm262_vm4, %v756_v36 }
 0x308   :  { %v754_v50 = vpop.permute.xlu1 %753 }
 0x3ac   :  { %v1304_v38 = vpop.f32.mrf.mxu1 }
 0x3ad   :  { %v349_v39 = vsel %vm255_vm5, %v1304_v38, -1e+30 }
 0x3ae   :  { %v339_v40 = vpop.f32.mrf.mxu1  ;;  %v354_v41 = vsel %vm350_vm6, %v349_v39, -inf }
 0x3af   :  { %v348_v42 = vsel %vm254_vm7, %v339_v40, -1e+30  ;;  %355 = vmax.xlane.f32.xlu0 %v354_v41  ;;  %v1317_v43 = vpop.f32.mrf.mxu0 }
 0x3b0   :  { %v515_v44 = vsel %vm255_vm5, %v1317_v43, -1e+30  ;;  %v351_v45 = vsel %vm350_vm6, %v348_v42, -inf }
 0x3b1   :  { %352 = vmax.xlane.f32.xlu1 %v351_v45  ;;  %v505_v46 = vpop.f32.mrf.mxu0  ;;  %v519_v47 = vsel %vm350_vm6, %v515_v44, -inf }
 0x3b2   :  { %v514_v48 = vsel %vm254_vm7, %v505_v46, -1e+30 }
 0x3b3   :  { %520 = vmax.xlane.f32.xlu0 %v519_v47  ;;  %v516_v49 = vsel %vm350_vm6, %v514_v48, -inf }
 0x3b5   :  { %517 = vmax.xlane.f32.xlu1 %v516_v49 }
 0x3c6   :  { %588 = vrot.lane.b32.xlu1 %v1697_v21, %s1518_s5 }
 0x3c9   :  { %590 = vrot.lane.b32.xlu0 %v1690_v17, %s1516_s7 }
 0x3ca   :  { %751 = vrot.lane.b32.xlu1 %v1697_v21, %s1519_s23 }
 0x3cd   :  { %586 = vrot.lane.b32.xlu0 %v1685_v11, %s1518_s5 }
 0x3d1   :  { %749 = vrot.lane.b32.xlu0 %v1685_v11, %s1519_s23 }
 0x438   :  { %v356_v51 = vpop.xlane.xlu0 %355 }
 0x439   :  { %v358_v52 = vsub.f32 %v349_v39, %v356_v51 }
 0x43a   :  { %v353_v53 = vpop.xlane.xlu1 %352 }
 0x43b   :  { %v361_v54 = vmul.f32 1.442695, %v358_v52  ;;  %v357_v55 = vsub.f32 %v348_v42, %v353_v53 }
 0x43c   :  { %v521_v56 = vpop.xlane.xlu0 %520 }
 0x43d   :  { %v359_v57 = vmul.f32 1.442695, %v357_v55  ;;  %v523_v58 = vsub.f32 %v515_v44, %v521_v56  ;;  %1435 = vpow2.f32 %v361_v54 }
 0x43e   :  { %v518_v59 = vpop.xlane.xlu1 %517 }
 0x43f   :  { %1437 = vpow2.f32 %v359_v57  ;;  %v526_v60 = vmul.f32 1.442695, %v523_v58  ;;  %v522_v61 = vsub.f32 %v514_v48, %v518_v59 }
 0x440   :  { %v591_v63 = vpop.permute.xlu0 %590 }
 0x441   :  { %v524_v62 = vmul.f32 1.442695, %v522_v61  ;;  %1439 = vpow2.f32 %v526_v60 }
 0x442   :  { %v589_v10 = vpop.permute.xlu1 %588 }
 0x443   :  { %1441 = vpow2.f32 %v524_v62 }
 0x444   :  { %v587_v5 = vpop.permute.xlu0 %586 }
 0x446   :  { %v752_v12 = vpop.permute.xlu1 %751 }
 0x448   :  { %v750_v11 = vpop.permute.xlu0 %749 }
 0x44a   :  { %v1770_v2 = vpop.eup %1435 }
 0x44b   :  { %v366_v55 = vsel %vm350_vm6, %v1770_v2, 0.0 }
 0x44c   :  { %v1772_v3 = vpop.eup %1437 }
 0x44d   :  { %v369_v4 = vpack.c.bf16 %v1770_v2, %v1772_v3  ;;  %v363_v60 = vsel %vm350_vm6, %v1772_v3, 0.0 }
 0x44e   :  { %v1440_v6 = vpop.eup %1439 }
 0x44f   :  { %1308 = vmatmul.mubr.msk.bf16.vlgmr.msra.gmra.mxu1 %vm350_vm6, %v369_v4 }
 0x450   :  { %v1442_v8 = vpop.eup %1441  ;;  %1325 = vmatpush3.xpose.msk.msra.mxu1 %vm262_vm4, %v593_v35  ;;  %1328 = vmatprep.mubr.msk.f32.mxu1 %vm262_vm4, %v587_v5 }
 0x451   :  { %1326 = vmatprep.subr.msk.mxu1 %vm262_vm4, %v591_v63  ;;  %v534_v9 = vpack.c.bf16 %v1440_v6, %v1442_v8  ;;  %v528_v32 = vsel %vm350_vm6, %v1442_v8, 0.0 }
 0x453   :  { %1321 = vmatmul.mubr.msk.bf16.vlgmr.msra.gmra.mxu0 %vm350_vm6, %v534_v9 }
 0x454   :  { %1327 = vmatpush3.xpose.msk.msra.mxu1 %vm262_vm4, %v591_v63  ;;  %1338 = vmatpush3.xpose.msk.msra.mxu0 %vm262_vm4, %v756_v36  ;;  %v531_v36 = vsel %vm350_vm6, %v1440_v6, 0.0 }
 0x455   :  { %1339 = vmatprep.subr.msk.mxu0 %vm262_vm4, %v754_v50  ;;  %1341 = vmatprep.mubr.msk.f32.mxu0 %vm262_vm4, %v750_v11  ;;  %v1423_v11 = vld [vmem:[%s1916_s8 + $0x8] sm:$0xff]  }
 0x456   :  { %1331 = vmatprep.subr.bf16.mxu1 %v1501_v7 }
 0x457   :  { %1329 = vmatmul.mubr.msk.f32.vlgmr.msra.gmra.mxu1 %vm262_vm4, %v589_v10 }
 0x458   :  { %1340 = vmatpush3.xpose.msk.msra.mxu0 %vm262_vm4, %v754_v50  ;;  %1333 = vmatprep.mubr.msk.bf16.mxu1 %vm1502_vm1, %v1501_v7 }
 0x459   :  { %1344 = vmatprep.subr.bf16.mxu0 %v1501_v7 }
 0x45b   :  { %1342 = vmatmul.mubr.msk.f32.vlgmr.msra.gmra.mxu0 %vm262_vm4, %v752_v12 }
 0x45c   :  { %1346 = vmatprep.mubr.msk.bf16.mxu0 %vm1502_vm1, %v1501_v7 }
 0x50f   :  { %v1794_v13 = vpop.f32.mrf.mxu1 }
 0x511   :  { %v1309_v14 = vpop.f32.mrf.mxu1 }
 0x512   :  { %v1424_v14 = vld [vmem:[%s1916_s8] sm:$0xff]   ;;  %s1524_s8 = smov 24  }
 0x513   :  { %v1796_v15 = vpop.f32.mrf.mxu1  ;;  %v1798_v16 = vpop.f32.mrf.mxu0 }
 0x515   :  { %v1310_v17 = vpop.f32.mrf.mxu1  ;;  %v1322_v18 = vpop.f32.mrf.mxu0 }
 0x517   :  { %v1800_v19 = vpop.f32.mrf.mxu0  ;;  %v1330_v20 = vpop.f32.mrf.mxu1 }
 0x518   :  { %v678_v21 = vsel %vm255_vm5, %v1330_v20, -1e+30 }
 0x519   :  { %v1323_v22 = vpop.f32.mrf.mxu0  ;;  %v682_v23 = vsel %vm350_vm6, %v678_v21, -inf  ;;  %v668_v25 = vpop.f32.mrf.mxu1 }
 0x51a   :  { %683 = vmax.xlane.f32.xlu1 %v682_v23  ;;  %v677_v29 = vsel %vm254_vm7, %v668_v25, -1e+30 }
 0x51b   :  { %v1343_v26 = vpop.f32.mrf.mxu0  ;;  %v679_v33 = vsel %vm350_vm6, %v677_v29, -inf }
 0x51c   :  { %v841_v27 = vsel %vm255_vm5, %v1343_v26, -1e+30 }
 0x51d   :  { %v845_v28 = vsel %vm350_vm6, %v841_v27, -inf  ;;  %v831_v30 = vpop.f32.mrf.mxu0 }
 0x51e   :  { %846 = vmax.xlane.f32.xlu0 %v845_v28  ;;  %v840_v34 = vsel %vm254_vm7, %v831_v30, -1e+30 }
 0x51f   :  { %v842_v35 = vsel %vm350_vm6, %v840_v34, -inf }
 0x522   :  { %680 = vmax.xlane.f32.xlu0 %v679_v33 }
 0x526   :  { %843 = vmax.xlane.f32.xlu0 %v842_v35 }
 0x52b   :  { %698 = vrot.lane.b32.xlu1 %v1708_v24, %s1520_s24 }
 0x53c   :  { %861 = vrot.lane.b32.xlu0 %v1708_v24, %s1521_s25 }
 0x54f   :  { %529 = vadd.xlane.f32.xlu1 %v528_v32 }
 0x55b   :  { %532 = vadd.xlane.f32.xlu0 %v531_v36 }
 0x5a3   :  { %v684_v38 = vpop.xlane.xlu1 %683 }
 0x5a4   :  { %v686_v39 = vsub.f32 %v678_v21, %v684_v38 }
 0x5a6   :  { %v689_v31 = vmul.f32 1.442695, %v686_v39 }
 0x5a7   :  { %v847_v37 = vpop.xlane.xlu0 %846  ;;  %v699_v40 = vpop.permute.xlu1 %698 }
 0x5a8   :  { %1443 = vpow2.f32 %v689_v31  ;;  %v849_v41 = vsub.f32 %v841_v27, %v847_v37  ;;  %1332 = vmatpush3.bf16.msra.mxu1 %v699_v40 }
 0x5a9   :  { %1350 = vmatprep.subr.bf16.mxu1 %v1501_v7 }
 0x5aa   :  { %v852_v42 = vmul.f32 1.442695, %v849_v41 }
 0x5ab   :  { %v681_v43 = vpop.xlane.xlu0 %680 }
 0x5ac   :  { %1445 = vpow2.f32 %v852_v42  ;;  %v685_v24 = vsub.f32 %v677_v29, %v681_v43 }
 0x5ae   :  { %v687_v44 = vmul.f32 1.442695, %v685_v24 }
 0x5af   :  { %v844_v45 = vpop.xlane.xlu0 %843 }
 0x5b0   :  { %1447 = vpow2.f32 %v687_v44  ;;  %v848_v46 = vsub.f32 %v840_v34, %v844_v45 }
 0x5b2   :  { %v850_v47 = vmul.f32 1.442695, %v848_v46 }
 0x5b3   :  { %v862_v48 = vpop.permute.xlu0 %861 }
 0x5b4   :  { %1449 = vpow2.f32 %v850_v47  ;;  %1345 = vmatpush3.bf16.msra.mxu0 %v862_v48 }
 0x5b5   :  { %v1444_v49 = vpop.eup %1443  ;;  %1358 = vmatprep.subr.bf16.mxu0 %v1501_v7 }
 0x5b6   :  { %v694_v50 = vsel %vm350_vm6, %v1444_v49, 0.0 }
 0x5b7   :  { %695 = vadd.xlane.f32.xlu0 %v694_v50 }
 0x5b9   :  { %v1446_v51 = vpop.eup %1445 }
 0x5ba   :  { %v857_v52 = vsel %vm350_vm6, %v1446_v51, 0.0 }
 0x5bb   :  { %858 = vadd.xlane.f32.xlu0 %v857_v52 }
 0x5bd   :  { %v1448_v53 = vpop.eup %1447 }
 0x5be   :  { %v691_v54 = vsel %vm350_vm6, %v1448_v53, 0.0  ;;  %v697_v56 = vpack.c.bf16 %v1444_v49, %v1448_v53 }
 0x5bf   :  { %692 = vadd.xlane.f32.xlu1 %v691_v54  ;;  %367 = vadd.xlane.f32.xlu0 %v366_v55 }
 0x5c0   :  { %1334 = vmatmul.mubr.msk.bf16.vlgmr.msra.gmra.mxu1 %vm350_vm6, %v697_v56 }
 0x5c1   :  { %v1450_v57 = vpop.eup %1449  ;;  %1354 = vmatprep.mubr.msk.bf16.mxu1 %vm1502_vm1, %v1501_v7  ;;  %1351 = vmatpush3.bf16.msra.mxu1 %v1423_v11  ;;  %v1243_v11 = vld [vmem:[%s1920_s12] ss:$0 sm:$0xff] }
 0x5c2   :  { %v854_v58 = vsel %vm350_vm6, %v1450_v57, 0.0  ;;  %v860_v59 = vpack.c.bf16 %v1446_v51, %v1450_v57  ;;  %1352 = vmatprep.subr.bf16.mxu1 %v1501_v7 }
 0x5c3   :  { %855 = vadd.xlane.f32.xlu1 %v854_v58 }
 0x5c4   :  { %1347 = vmatmul.mubr.msk.bf16.vlgmr.msra.gmra.mxu0 %vm350_vm6, %v860_v59 }
 0x5c5   :  { %1362 = vmatprep.mubr.msk.bf16.mxu0 %vm1502_vm1, %v1501_v7  ;;  %1353 = vmatpush3.bf16.msra.mxu1 %v1424_v14 }
 0x5c6   :  { %1366 = vmatprep.subr.bf16.mxu1 %v1501_v7 }
 0x5c7   :  { %364 = vadd.xlane.f32.xlu1 %v363_v60 }
 0x5d8   :  { %v530_v61 = vpop.xlane.xlu1 %529 }
 0x5d9   :  { %1451 = vrcp.f32 %v530_v61 }
 0x5e4   :  { %v533_v62 = vpop.xlane.xlu0 %532 }
 0x5e5   :  { %1453 = vrcp.f32 %v533_v62 }
 0x5e6   :  { %v1452_v63 = vpop.eup %1451 }
 0x5e7   :  { %v584_v4 = vmul.f32 %v1452_v63, %v1798_v16 }
 0x5f2   :  { %v1454_v2 = vpop.eup %1453 }
 0x5f3   :  { %v585_v5 = vmul.f32 %v1454_v2, %v1800_v19 }
 0x5f5   :  { %v1406_v6 = vpack.i.bf16 %v585_v5, %v584_v4 }
 0x5f7   :  { %1407 = vrot.lane.b32.xlu1 %v1406_v6, %s1522_s26 }
 0x640   :  { %v696_v8 = vpop.xlane.xlu0 %695 }
 0x641   :  { %1455 = vrcp.f32 %v696_v8 }
 0x644   :  { %v859_v10 = vpop.xlane.xlu0 %858 }
 0x648   :  { %v693_v9 = vpop.xlane.xlu1 %692  ;;  %v368_v32 = vpop.xlane.xlu0 %367 }
 0x649   :  { %1457 = vrcp.f32 %v693_v9 }
 0x64a   :  { %1459 = vrcp.f32 %v859_v10 }
 0x64c   :  { %v856_v3 = vpop.xlane.xlu1 %855 }
 0x64d   :  { %1461 = vrcp.f32 %v856_v3 }
 0x64e   :  { %v1456_v17 = vpop.eup %1455  ;;  %1463 = vrcp.f32 %v368_v32 }
 0x650   :  { %v365_v36 = vpop.xlane.xlu1 %364 }
 0x651   :  { %1465 = vrcp.f32 %v365_v36 }
 0x656   :  { %v1458_v18 = vpop.eup %1457 }
 0x657   :  { %v1460_v26 = vpop.eup %1459 }
 0x65a   :  { %v1462_v28 = vpop.eup %1461 }
 0x65b   :  { %v1464_v39 = vpop.eup %1463 }
 0x65c   :  { %v422_v44 = vmul.f32 %v1464_v39, %v1796_v15 }
 0x65e   :  { %v1466_v31 = vpop.eup %1465 }
 0x65f   :  { %v421_v24 = vmul.f32 %v1466_v31, %v1794_v13 }
 0x669   :  { %v1408_v38 = vpop.permute.xlu1 %1407 }
 0x66a   :  { %v1410_v40 = vunpack.i.h.bf16 %v1408_v38  ;;  %v1409_v41 = vunpack.i.l.bf16 %v1408_v38 }
 0x66c   :  { %v937_v46 = vsel %vm262_vm4, %v422_v44, %v1410_v40  ;;  %v936_v47 = vsel %vm262_vm4, %v421_v24, %v1409_v41 }
 0x680   :  { %v738_v12 = vpop.f32.mrf.mxu1 }
 0x681   :  { %v747_v21 = vmul.f32 %v1458_v18, %v738_v12  ;;  %v1427_v18 = vld [vmem:[%s1918_s10 + $0x18] sm:$0xff]  }
 0x682   :  { %v1335_v16 = vpop.f32.mrf.mxu1 }
 0x684   :  { %v741_v19 = vpop.f32.mrf.mxu1  ;;  %v901_v20 = vpop.f32.mrf.mxu0 }
 0x685   :  { %v748_v22 = vmul.f32 %v1456_v17, %v741_v19  ;;  %v910_v30 = vmul.f32 %v1462_v28, %v901_v20  ;;  %v1428_v19 = vld [vmem:[%s1918_s10 + $0x10] sm:$0xff]   ;;  %v1429_v20 = vld [vmem:[%s1918_s10 + $0x8] sm:$0xff]  }
 0x686   :  { %v1336_v23 = vpop.f32.mrf.mxu1  ;;  %v1348_v25 = vpop.f32.mrf.mxu0 }
 0x687   :  { %v1411_v27 = vpack.i.bf16 %v748_v22, %v747_v21  ;;  %v1430_v21 = vld [vmem:[%s1918_s10] sm:$0xff]   ;;  %s1525_s10 = smov [#allocation2]  }
 0x688   :  { %v904_v29 = vpop.f32.mrf.mxu0 }
 0x689   :  { %v911_v33 = vmul.f32 %v1460_v26, %v904_v29  ;;  %1412 = vrot.lane.b32.xlu0 %v1411_v27, %s1523_s2 }
 0x68a   :  { %v1349_v34 = vpop.f32.mrf.mxu0 }
 0x68b   :  { %v1416_v35 = vpack.i.bf16 %v911_v33, %v910_v30 }
 0x68d   :  { %1417 = vrot.lane.b32.xlu1 %v1416_v35, %s1524_s8 }
 0x6fb   :  { %v1413_v37 = vpop.permute.xlu0 %1412 }
 0x6fc   :  { %v1415_v42 = vunpack.i.h.bf16 %v1413_v37  ;;  %v1414_v43 = vunpack.i.l.bf16 %v1413_v37 }
 0x6fe   :  { %v938_v50 = vsel %vm350_vm6, %v936_v47, %v1414_v43  ;;  %v939_v51 = vsel %vm350_vm6, %v937_v46, %v1415_v42 }
 0x6ff   :  { %v1418_v45 = vpop.permute.xlu1 %1417 }
 0x700   :  { %v1420_v48 = vunpack.i.h.bf16 %v1418_v45  ;;  %v1419_v49 = vunpack.i.l.bf16 %v1418_v45 }
 0x702   :  { %v941_v52 = vsel %vm940_vm8, %v938_v50, %v1419_v49  ;;  %v942_v53 = vsel %vm940_vm8, %v939_v51, %v1420_v48 }
 0x703   :  { %v943_v54 = vpack.c.bf16 %v942_v53, %v941_v52 }
 0x705   :  { %1355 = vmatmul.mubr.msk.bf16.vlgmr.msra.gmra.mxu1 %vm50_vm0, %v943_v54 }
 0x706   :  { %1374 = vmatprep.mubr.msk.bf16.mxu1 %vm1502_vm1, %v1501_v7  ;;  %1367 = vmatpush3.bf16.msra.mxu1 %v1427_v18 }
 0x707   :  { %1368 = vmatprep.subr.bf16.mxu1 %v1501_v7 }
 0x70a   :  { %1369 = vmatpush3.bf16.msra.mxu1 %v1428_v19 }
 0x70b   :  { %1370 = vmatprep.subr.bf16.mxu1 %v1501_v7 }
 0x70e   :  { %1371 = vmatpush3.bf16.msra.mxu1 %v1429_v20 }
 0x70f   :  { %1372 = vmatprep.subr.bf16.mxu1 %v1501_v7 }
 0x712   :  { %1373 = vmatpush3.bf16.msra.mxu1 %v1430_v21 }
 0x7c5   :  { %v997_v13 = vpop.f32.mrf.mxu1 }
 0x7c6   :  { %v1859_v15 = vadd.f32 %v997_v13, %v1600_v0  ;;  %v1425_v0 = vld [vmem:[%s1917_s9 + $0x8] sm:$0xff]  }
 0x7c7   :  { %v1356_v55 = vpop.f32.mrf.mxu1  ;;  %1359 = vmatpush3.bf16.msra.mxu0 %v1425_v0 }
 0x7c8   :  { %v1006_v56 = vmul.f32 %v1859_v15, %v1859_v15  ;;  %1360 = vmatprep.subr.bf16.mxu0 %v1501_v7 }
 0x7c9   :  { %v1000_v57 = vpop.f32.mrf.mxu1 }
 0x7ca   :  { %v1864_v58 = vadd.f32 %v1000_v57, %v1605_v1  ;;  %v1008_v59 = vsel %vm50_vm0, %v1006_v56, 0.0  ;;  %v1426_v1 = vld [vmem:[%s1917_s9] sm:$0xff]  }
 0x7cb   :  { %1009 = vadd.xlane.f32.xlu1 %v1008_v59  ;;  %v1357_v60 = vpop.f32.mrf.mxu1  ;;  %1361 = vmatpush3.bf16.msra.mxu0 %v1426_v1 }
 0x7cc   :  { %v1007_v61 = vmul.f32 %v1864_v58, %v1864_v58 }
 0x7ce   :  { %v1011_v62 = vsel %vm50_vm0, %v1007_v61, 0.0 }
 0x7cf   :  { %1012 = vadd.xlane.f32.xlu0 %v1011_v62 }
 0x854   :  { %v1010_v63 = vpop.xlane.xlu1 %1009 }
 0x855   :  { %v1014_v2 = vmul.f32 0.03125, %v1010_v63 }
 0x857   :  { %v1016_v4 = vadd.f32 1e-06, %v1014_v2 }
 0x858   :  { %v1013_v5 = vpop.xlane.xlu0 %1012 }
 0x859   :  { %1467 = vrsqrt.f32 %v1016_v4  ;;  %v1015_v6 = vmul.f32 0.03125, %v1013_v5 }
 0x85b   :  { %v1017_v8 = vadd.f32 1e-06, %v1015_v6 }
 0x85d   :  { %1469 = vrsqrt.f32 %v1017_v8 }
 0x866   :  { %v1468_v9 = vpop.eup %1467 }
 0x867   :  { %v1020_v10 = vmul.f32 %v1468_v9, %v1859_v15 }
 0x869   :  { %v1029_v14 = vmul.f32 %v1243_v11, %v1020_v10 }
 0x86a   :  { %v1470_v3 = vpop.eup %1469 }
 0x86b   :  { %v1021_v12 = vmul.f32 %v1470_v3, %v1864_v58 }
 0x86d   :  { %v1030_v16 = vmul.f32 %v1243_v11, %v1021_v12 }
 0x86f   :  { %v1031_v17 = vpack.c.bf16 %v1030_v16, %v1029_v14 }
 0x871   :  { %1363 = vmatmul.mubr.msk.bf16.vlgmr.msra.gmra.mxu0 %vm50_vm0, %v1031_v17 }
 0x931   :  { %v1085_v22 = vpop.f32.mrf.mxu0 }
 0x932   :  { %1108 = vrot.lane.b32.xlu0 %v1085_v22, %s1514_s19  ;;  %v1092_v27 = vsub.f32 0.0, %v1085_v22 }
 0x933   :  { %v1364_v23 = vpop.f32.mrf.mxu0 }
 0x934   :  { %v1094_v29 = vmul.f32 1.442695, %v1092_v27 }
 0x935   :  { %v1088_v25 = vpop.f32.mrf.mxu0 }
 0x936   :  { %1110 = vrot.lane.b32.xlu1 %v1088_v25, %s1514_s19  ;;  %v1093_v28 = vsub.f32 0.0, %v1088_v25  ;;  %1471 = vpow2.f32 %v1094_v29  ;;  %s1203_s19 = sshll.u32 %s1525_s10, 4  ;;  %s1204_s19 = int_to_ptr.vmem [resolvable:$true] %s1203_s19 }
 0x937   :  { %v1365_v26 = vpop.f32.mrf.mxu0  ;;  %s1479_s21 = scalar_lea.vmem %s1204_s19, 256  ;;  %p1484_p1 = scmp.lt.s32.totalorder %s1204_s19, %s1204_s19 }
 0x938   :  { %v1096_v30 = vmul.f32 1.442695, %v1093_v28  ;;  %p1480_p0 = scmp.ne.s32.totalorder %s1204_s19, %s1479_s21  ;;  %p1485_p2 = scmp.lt.s32.totalorder %s1479_s21, %s1479_s21 }
 0x93a   :  { %1473 = vpow2.f32 %v1096_v30  ;;  %p1486_p3 = por %p1485_p2, %p1484_p1 }
 0x93c   :  { %p1487_p4 = pnand %p1486_p3, %p1480_p0 }
 0x943   :  { %v1472_v7 = vpop.eup %1471 }
 0x944   :  { %v1098_v34 = vadd.f32 1.0, %v1472_v7 }
 0x946   :  { %1475 = vrcp.f32 %v1098_v34 }
 0x947   :  { %v1474_v33 = vpop.eup %1473 }
 0x948   :  { %v1099_v35 = vadd.f32 1.0, %v1474_v33 }
 0x94a   :  { %1477 = vrcp.f32 %v1099_v35 }
 0x953   :  { %v1476_v32 = vpop.eup %1475 }
 0x954   :  { %v1104_v39 = vmul.f32 %v1476_v32, %v1085_v22 }
 0x957   :  { %v1478_v36 = vpop.eup %1477 }
 0x958   :  { %v1105_v31 = vmul.f32 %v1478_v36, %v1088_v25 }
 0x9a4   :  { %v1109_v38 = vpop.permute.xlu0 %1108 }
 0x9a5   :  { %v1114_v40 = vmul.f32 %v1109_v38, %v1104_v39 }
 0x9a8   :  { %v1111_v37 = vpop.permute.xlu1 %1110 }
 0x9a9   :  { %v1115_v41 = vmul.f32 %v1111_v37, %v1105_v31 }
 0x9ab   :  { %v1116_v42 = vpack.c.bf16 %v1115_v41, %v1114_v40 }
 0x9ad   :  { %1375 = vmatmul.mubr.msk.bf16.vlgmr.msra.gmra.mxu1 %vm1149_vm9, %v1116_v42 }
 0xa6d   :  { %v1187_v43 = vpop.f32.mrf.mxu1 }
 0xa6e   :  { %v1194_v24 = vadd.f32 %v1187_v43, %v1859_v15 }
 0xa6f   :  { %v1376_v44 = vpop.f32.mrf.mxu1 }
 0xa70   :  { %1196 = vst.msk [vmem:[#allocation2] sm:$0xff] %vm50_vm0, %v1194_v24 }
 0xa71   :  { %v1190_v45 = vpop.f32.mrf.mxu1 }
 0xa72   :  { %v1195_v46 = vadd.f32 %v1190_v45, %v1864_v58 }
 0xa73   :  { %v1377_v47 = vpop.f32.mrf.mxu1 }
 0xa74   :  { %1197 = vst.msk [vmem:[#allocation2 + $0x8] sm:$0xff] %vm50_vm0, %v1195_v46 }
 0xa75   :  { %1490 = shalt.err (!%p1487_p4)
}
 0xa76   :  { %s1526_s4 = smov 128  }
 0xa77   :  { %1209 = dma.vmem_to_hbm [thread:$0]  %s1204_s19, 256, %s1921_s13, [#allocation3], %s1526_s4, %s1526_s4, %s1522_s26  }
 0xa78   :  { %1499 = dma.done.wait [#allocation3], 256  }
 0xa79   :  { %1500 = vsyncadd [#allocation3], 4294967040 }
 0xa7a   :  { %1213 = vsyncpa [#allocation3], 1 }

</bundles_post_ra>
